<compile_context>
chip_gen: v6e
topology: v6e:2x2x1
jax: 0.10.0
libtpu: 0.0.40
codegen_flags: <defaults>
</compile_context>

<pallas_src>
import math
import functools

import jax
import jax.numpy as jnp
import numpy as np
from jax.experimental import pallas as pl
from jax.experimental.pallas import tpu as pltpu


def _feat2img_kernel(s_ref, x_ref, o_ref, *, p, c_out, Hb, W, Wc):
    """One (batch, row-tile) grid step.

    s_ref : (p, Wc, p*Wc)            resident one-hot column-scatter slices
    x_ref : (1, p, p, c_out, Hb, W)  all patch planes for this row tile
    o_ref : (1, c_out, Hb, p*p*W)    row phase i lives at lanes [i*p*W, (i+1)*p*W)
    """
    Wo = p * W
    pWc = p * Wc
    # p and W // Wc are tiny static ints -> full unroll, every offset is static.
    for i in range(p):
        for wc in range(W // Wc):
            w0 = wc * Wc
            acc = None
            for j in range(p):
                if Wc == W:
                    lhs = x_ref[0, i, j].reshape(c_out * Hb, Wc)
                else:
                    lhs = x_ref[0, i, j, :, :, w0:w0 + Wc].reshape(c_out * Hb, Wc)
                # One-hot scatter matmul: exact in any float dtype, so emit and
                # accumulate directly in the output dtype (no f32 acc / cast).
                d = jnp.dot(lhs, s_ref[j], preferred_element_type=o_ref.dtype)
                acc = d if acc is None else acc + d
            lane0 = i * Wo + w0 * p
            # Disjoint, contiguous lane-range store (128-aligned when p*Wc%128==0).
            o_ref[0, :, :, lane0:lane0 + pWc] = acc.reshape(c_out, Hb, pWc)


def _vmem_capacity_bytes():
    try:
        info = pltpu.get_tpu_info()
        for name in ("vmem_capacity_bytes", "vmem_size_bytes", "vmem_bytes"):
            v = getattr(info, name, None)
            if v:
                return int(v)
    except Exception:
        pass
    return 64 << 20  # conservative (v7x-sized) fallback


def _pick_wc(W, p):
    """Column-chunk width: tiny scatter matrix, lane-aligned stores, mem-bound."""
    # Preferred: p*Wc in {256, 128} -> aligned stores, K small enough to stay
    # memory-bound on every generation (v5e's f32 MXU included).
    for pwc in (256, 128):
        if pwc % p == 0:
            c = pwc // p
            if c <= W and W % c == 0:
                return c
    # Aligned but a bit wider.
    upper = min(W, max(1, 512 // p))
    for c in range(upper, 0, -1):
        if W % c == 0 and (p * c) % 128 == 0:
            return c
    # Unaligned fallback (small / odd W): just bound the scatter-matrix size.
    for c in range(min(W, 256), 31, -1):
        if W % c == 0:
            return c
    return W


def _pick_row_block(H, N, io_bytes_per_row, budget, min_steps=8):
    """Largest row tile (multiple of 8 dividing H, or H) under the VMEM budget,
    then shrunk until the grid has enough steps to pipeline / use both v7x TCs."""
    cands = sorted({d for d in range(8, H + 1, 8) if H % d == 0} | {H}, reverse=True)
    idx = len(cands) - 1
    for k, c in enumerate(cands):
        if 2 * io_bytes_per_row * c <= budget:   # x2: double-buffered in + out
            idx = k
            break
    while N * (H // cands[idx]) < min_steps and idx + 1 < len(cands):
        idx += 1
    return cands[idx]


def feat_map2img(x, output_channel=3, is_square=True, *, row_block=None, col_chunk=None):
    """JAX/Pallas equivalent of Feat_map2Img.forward (NCHW in, NCHW out)."""
    if not is_square:
        raise NotImplementedError
    N, C, H, W = x.shape
    assert C % output_channel == 0
    p = int(math.isqrt(C // output_channel))
    assert p * p * output_channel == C, "C // output_channel must be a perfect square"
    c_out = output_channel

    # p == 1: the rearrange is the identity -- skip the kernel entirely.
    if p == 1:
        return x

    # TODO(synk): integer dtypes would route through the MXU (inexact >= 2^24 and
    # unsupported on v7x); use a plain XLA transpose for them instead of the kernel.
    if not jnp.issubdtype(x.dtype, jnp.floating):
        x6 = x.reshape(N, p, p, c_out, H, W)
        return x6.transpose(0, 3, 4, 1, 5, 2).reshape(N, c_out, H * p, W * p)

    isz = x.dtype.itemsize
    Wo = W * p

    # Column chunking: the full scatter matrix is block-diagonal, so one tiny
    # (p, Wc, p*Wc) one-hot tensor is reused for every Wc-wide column chunk.
    Wc = col_chunk if col_chunk is not None else _pick_wc(W, p)
    assert W % Wc == 0

    # Per-generation VMEM budget for the (double-buffered) in + out blocks.
    vmem_cap = _vmem_capacity_bytes()
    budget = (24 << 20) if vmem_cap >= (100 << 20) else (8 << 20)   # v5e/v6e vs v7x
    io_bytes_per_row = 2 * p * p * c_out * W * isz                  # in + out per H row
    Hb = row_block if row_block is not None else _pick_row_block(H, N, io_bytes_per_row, budget)
    assert H % Hb == 0

    # Resident one-hot column-scatter slices: S[j, w, w*p + j] = 1 (exact in bf16 too).
    s_np = np.zeros((p, Wc, p * Wc), dtype=np.float32)
    w_idx = np.arange(Wc)
    for j in range(p):
        s_np[j, w_idx, w_idx * p + j] = 1.0
    s_mat = jnp.asarray(s_np, dtype=x.dtype)

    # Pure glue: split the channel axis (leading dims only, no data movement).
    x6 = x.reshape(N, p, p, c_out, H, W)

    kernel = functools.partial(_feat2img_kernel, p=p, c_out=c_out, Hb=Hb, W=W, Wc=Wc)
    grid = (N, H // Hb)

    # Honest VMEM sizing: double-buffered in+out blocks + resident scatter (x2 for
    # its buffer pair) + per-chunk accumulator / lhs temporaries + headroom.
    in_out_bytes = 2 * io_bytes_per_row * Hb
    s_bytes = 2 * int(s_mat.size) * isz
    tmp_bytes = 3 * c_out * Hb * p * Wc * max(isz, 4)
    vmem_need = in_out_bytes + s_bytes + tmp_bytes + (2 << 20)
    vmem_limit = int(min(vmem_cap * 9 // 10, max(vmem_need, 32 << 20)))

    out_elems = N * c_out * H * W * p * p
    flops = 2 * p * Wc * out_elems                      # p one-hot dots (K = Wc) per tile
    bytes_accessed = 2 * x.size * isz + int(s_mat.size) * isz

    out_flat = pl.pallas_call(
        kernel,
        out_shape=jax.ShapeDtypeStruct((N, c_out, H, p * Wo), x.dtype),
        grid_spec=pltpu.PrefetchScalarGridSpec(
            num_scalar_prefetch=0,
            grid=grid,
            in_specs=[
                # Tiny resident scatter tensor (constant index_map -> fetched once).
                pl.BlockSpec((p, Wc, p * Wc), lambda b, hb: (0, 0, 0)),
                pl.BlockSpec((1, p, p, c_out, Hb, W),
                             lambda b, hb: (b, 0, 0, 0, hb, 0)),
            ],
            out_specs=pl.BlockSpec((1, c_out, Hb, p * Wo),
                                   lambda b, hb: (b, 0, hb, 0)),
        ),
        compiler_params=pltpu.CompilerParams(
            dimension_semantics=("parallel", "parallel"),
            vmem_limit_bytes=vmem_limit,
        ),
        cost_estimate=pl.CostEstimate(
            flops=int(flops), transcendentals=0, bytes_accessed=int(bytes_accessed)),
    )(s_mat, x6)

    # Free contiguous reshape: (N, c, H, p*Wo) -> (N, c, H*p, Wo);
    # lane range i of row h becomes image row h*p + i.
    return out_flat.reshape(N, c_out, H * p, Wo)


def _reference(x, output_channel=3):
    # Pure-JAX reference of 'b (p1 p2 c) h w -> b c (h p1) (w p2)'.
    N, C, H, W = x.shape
    p = int(math.isqrt(C // output_channel))
    x6 = x.reshape(N, p, p, output_channel, H, W)
    return x6.transpose(0, 3, 4, 1, 5, 2).reshape(N, output_channel, H * p, W * p)


if __name__ == "__main__":
    # Module has no learnable parameters; only the input tensor is needed.
    output_channel = 3
    patch_size = 2
    N, H, W = 2, 16, 32
    C = output_channel * patch_size * patch_size  # 12

    key = jax.random.PRNGKey(0)
    x = jax.random.normal(key, (N, C, H, W), dtype=jnp.float32)

    out = feat_map2img(x, output_channel=output_channel)
    out = jax.block_until_ready(out)

    ref = _reference(x, output_channel=output_channel)
    assert out.shape == (N, output_channel, H * patch_size, W * patch_size)
    assert np.allclose(np.asarray(out), np.asarray(ref)), "mismatch vs reference"

    print("KERNEL_OK")
</pallas_src>

<mosaic_0001>
module attributes {stable_mosaic.version = 11 : i64} {
  func.func @_feat2img_kernel(%arg0: i32, %arg1: i32, %arg2: memref<2x32x64xf32, #tpu.memory_space<vmem>>, %arg3: memref<1x2x2x3x8x32xf32, #tpu.memory_space<vmem>>, %arg4: memref<1x3x8x128xf32, #tpu.memory_space<vmem>>) attributes {dimension_semantics = [#tpu.dimension_semantics<parallel>, #tpu.dimension_semantics<parallel>], iteration_bounds = array<i64: 2, 2>, scalar_prefetch = 0 : i64, scratch_operands = 0 : i64, tpu.core_type = #tpu.core_type<tc>, window_params = [{pipeline_mode = #tpu.pipeline_mode<synchronous>, transform_indices = @transform_0, window_bounds = array<i64: 2, 32, 64>}, {transform_indices = @transform_1, window_bounds = array<i64: 1, 2, 2, 3, 8, 32>}, {transform_indices = @transform_2, window_bounds = array<i64: 1, 3, 8, 128>}]} {
    %c0 = arith.constant 0 : index
    %c0_0 = arith.constant 0 : index
    %c0_1 = arith.constant 0 : index
    %c0_2 = arith.constant 0 : index
    %c0_3 = arith.constant 0 : index
    %c0_4 = arith.constant 0 : index
    %0 = vector.load %arg3[%c0, %c0_0, %c0_1, %c0_2, %c0_3, %c0_4] : memref<1x2x2x3x8x32xf32, #tpu.memory_space<vmem>>, vector<1x1x1x3x8x32xf32>
    %1 = vector.shape_cast %0 : vector<1x1x1x3x8x32xf32> to vector<3x8x32xf32>
    %2 = vector.shape_cast %1 : vector<3x8x32xf32> to vector<24x32xf32>
    %c0_5 = arith.constant 0 : index
    %c0_6 = arith.constant 0 : index
    %c0_7 = arith.constant 0 : index
    %3 = vector.load %arg2[%c0_5, %c0_6, %c0_7] : memref<2x32x64xf32, #tpu.memory_space<vmem>>, vector<1x32x64xf32>
    %4 = vector.shape_cast %3 : vector<1x32x64xf32> to vector<32x64xf32>
    %cst = arith.constant dense<0.000000e+00> : vector<24x64xf32>
    %5 = tpu.matmul %2, %4, %cst {dimension_numbers = #tpu.dot_dimension_numbers<[1], [0], [0], [1], [0, 0, 1, 1], [], []>} : vector<24x32xf32>, vector<32x64xf32>, vector<24x64xf32> -> vector<24x64xf32>
    %c0_8 = arith.constant 0 : index
    %c0_9 = arith.constant 0 : index
    %c1 = arith.constant 1 : index
    %c0_10 = arith.constant 0 : index
    %c0_11 = arith.constant 0 : index
    %c0_12 = arith.constant 0 : index
    %6 = vector.load %arg3[%c0_8, %c0_9, %c1, %c0_10, %c0_11, %c0_12] : memref<1x2x2x3x8x32xf32, #tpu.memory_space<vmem>>, vector<1x1x1x3x8x32xf32>
    %7 = vector.shape_cast %6 : vector<1x1x1x3x8x32xf32> to vector<3x8x32xf32>
    %8 = vector.shape_cast %7 : vector<3x8x32xf32> to vector<24x32xf32>
    %c1_13 = arith.constant 1 : index
    %c0_14 = arith.constant 0 : index
    %c0_15 = arith.constant 0 : index
    %9 = vector.load %arg2[%c1_13, %c0_14, %c0_15] : memref<2x32x64xf32, #tpu.memory_space<vmem>>, vector<1x32x64xf32>
    %10 = vector.shape_cast %9 : vector<1x32x64xf32> to vector<32x64xf32>
    %cst_16 = arith.constant dense<0.000000e+00> : vector<24x64xf32>
    %11 = tpu.matmul %8, %10, %cst_16 {dimension_numbers = #tpu.dot_dimension_numbers<[1], [0], [0], [1], [0, 0, 1, 1], [], []>} : vector<24x32xf32>, vector<32x64xf32>, vector<24x64xf32> -> vector<24x64xf32>
    %12 = arith.addf %5, %11 : vector<24x64xf32>
    %13 = vector.shape_cast %12 : vector<24x64xf32> to vector<3x8x64xf32>
    %c0_17 = arith.constant 0 : index
    %c0_18 = arith.constant 0 : index
    %c0_19 = arith.constant 0 : index
    %c0_20 = arith.constant 0 : index
    %14 = vector.load %arg4[%c0_17, %c0_18, %c0_19, %c0_20] : memref<1x3x8x128xf32, #tpu.memory_space<vmem>>, vector<1x3x8x64xf32>
    %15 = vector.shape_cast %14 : vector<1x3x8x64xf32> to vector<3x8x64xf32>
    %16 = vector.shape_cast %13 : vector<3x8x64xf32> to vector<1x3x8x64xf32>
    tpu.vector_store %arg4[%c0_17, %c0_18, %c0_19, %c0_20], %16 {strides = array<i32>} : memref<1x3x8x128xf32, #tpu.memory_space<vmem>>, vector<1x3x8x64xf32>,
    %c0_21 = arith.constant 0 : index
    %c1_22 = arith.constant 1 : index
    %c0_23 = arith.constant 0 : index
    %c0_24 = arith.constant 0 : index
    %c0_25 = arith.constant 0 : index
    %c0_26 = arith.constant 0 : index
    %17 = vector.load %arg3[%c0_21, %c1_22, %c0_23, %c0_24, %c0_25, %c0_26] : memref<1x2x2x3x8x32xf32, #tpu.memory_space<vmem>>, vector<1x1x1x3x8x32xf32>
    %18 = vector.shape_cast %17 : vector<1x1x1x3x8x32xf32> to vector<3x8x32xf32>
    %19 = vector.shape_cast %18 : vector<3x8x32xf32> to vector<24x32xf32>
    %c0_27 = arith.constant 0 : index
    %c0_28 = arith.constant 0 : index
    %c0_29 = arith.constant 0 : index
    %20 = vector.load %arg2[%c0_27, %c0_28, %c0_29] : memref<2x32x64xf32, #tpu.memory_space<vmem>>, vector<1x32x64xf32>
    %21 = vector.shape_cast %20 : vector<1x32x64xf32> to vector<32x64xf32>
    %cst_30 = arith.constant dense<0.000000e+00> : vector<24x64xf32>
    %22 = tpu.matmul %19, %21, %cst_30 {dimension_numbers = #tpu.dot_dimension_numbers<[1], [0], [0], [1], [0, 0, 1, 1], [], []>} : vector<24x32xf32>, vector<32x64xf32>, vector<24x64xf32> -> vector<24x64xf32>
    %c0_31 = arith.constant 0 : index
    %c1_32 = arith.constant 1 : index
    %c1_33 = arith.constant 1 : index
    %c0_34 = arith.constant 0 : index
    %c0_35 = arith.constant 0 : index
    %c0_36 = arith.constant 0 : index
    %23 = vector.load %arg3[%c0_31, %c1_32, %c1_33, %c0_34, %c0_35, %c0_36] : memref<1x2x2x3x8x32xf32, #tpu.memory_space<vmem>>, vector<1x1x1x3x8x32xf32>
    %24 = vector.shape_cast %23 : vector<1x1x1x3x8x32xf32> to vector<3x8x32xf32>
    %25 = vector.shape_cast %24 : vector<3x8x32xf32> to vector<24x32xf32>
    %c1_37 = arith.constant 1 : index
    %c0_38 = arith.constant 0 : index
    %c0_39 = arith.constant 0 : index
    %26 = vector.load %arg2[%c1_37, %c0_38, %c0_39] : memref<2x32x64xf32, #tpu.memory_space<vmem>>, vector<1x32x64xf32>
    %27 = vector.shape_cast %26 : vector<1x32x64xf32> to vector<32x64xf32>
    %cst_40 = arith.constant dense<0.000000e+00> : vector<24x64xf32>
    %28 = tpu.matmul %25, %27, %cst_40 {dimension_numbers = #tpu.dot_dimension_numbers<[1], [0], [0], [1], [0, 0, 1, 1], [], []>} : vector<24x32xf32>, vector<32x64xf32>, vector<24x64xf32> -> vector<24x64xf32>
    %29 = arith.addf %22, %28 : vector<24x64xf32>
    %30 = vector.shape_cast %29 : vector<24x64xf32> to vector<3x8x64xf32>
    %c0_41 = arith.constant 0 : index
    %c0_42 = arith.constant 0 : index
    %c0_43 = arith.constant 0 : index
    %c64 = arith.constant 64 : index
    %31 = vector.load %arg4[%c0_41, %c0_42, %c0_43, %c64] : memref<1x3x8x128xf32, #tpu.memory_space<vmem>>, vector<1x3x8x64xf32>
    %32 = vector.shape_cast %31 : vector<1x3x8x64xf32> to vector<3x8x64xf32>
    %33 = vector.shape_cast %30 : vector<3x8x64xf32> to vector<1x3x8x64xf32>
    tpu.vector_store %arg4[%c0_41, %c0_42, %c0_43, %c64], %33 {strides = array<i32>} : memref<1x3x8x128xf32, #tpu.memory_space<vmem>>, vector<1x3x8x64xf32>,
    return
  }
  func.func @transform_0(%arg0: i32, %arg1: i32) -> (i32, i32, i32) {
    %c0_i32 = arith.constant 0 : i32
    %c0_i32_0 = arith.constant 0 : i32
    %c0_i32_1 = arith.constant 0 : i32
    %c0_i32_2 = arith.constant 0 : i32
    return %c0_i32, %c0_i32_0, %c0_i32_1 : i32, i32, i32
  }
  func.func @transform_1(%arg0: i32, %arg1: i32) -> (i32, i32, i32, i32, i32, i32) {
    %c0_i32 = arith.constant 0 : i32
    %c0_i32_0 = arith.constant 0 : i32
    %c0_i32_1 = arith.constant 0 : i32
    %c0_i32_2 = arith.constant 0 : i32
    %c0_i32_3 = arith.constant 0 : i32
    return %arg0, %c0_i32, %c0_i32_0, %c0_i32_1, %arg1, %c0_i32_2 : i32, i32, i32, i32, i32, i32
  }
  func.func @transform_2(%arg0: i32, %arg1: i32) -> (i32, i32, i32, i32) {
    %c0_i32 = arith.constant 0 : i32
    %c0_i32_0 = arith.constant 0 : i32
    %c0_i32_1 = arith.constant 0 : i32
    return %arg0, %c0_i32, %arg1, %c0_i32_0 : i32, i32, i32, i32
  }
}

</mosaic_0001>

<bundles_post_ra>
// kernel: tpu_custom_call.1
= control target key start
LH: loop header
LB: loop body
LE: loop exit
PB: predicated region body
PF: predicated region fallthrough
CT: control target
= control target key end

     0   :  { %s1416_s0 = inlined_call_operand.hbm [shape: f32[2,32,64], index: 0, kind: input, shape index: {}]   ;;  %s1417_s1 = inlined_call_operand.hbm [shape: f32[2,2,2,3,16,32], index: 1, kind: input, shape index: {}]   ;;  %s1418_s2 = inlined_call_operand.hbm [shape: f32[2,3,16,128], index: 2, kind: output, shape index: {}]  }
   0x1   :  { %1427 = sst [smem:[#allocation14_spill]] %s1416_s0 }
   0x2   :  { %7 = vsyncpa [#allocation3], 0 }
   0x3   :  { %8 = vsyncpa [#allocation6], 0 }
   0x4   :  { %10 = vsyncpa [#allocation6 + $0x1], 0 }
   0x5   :  { %11 = vsyncpa [#allocation4], 0 }
   0x6   :  { %13 = vsyncpa [#allocation4 + $0x1], 0  ;;  %s1132_s9 = smov 0   ;;  %s1134_s10 = smov 0  }
   0x7   :  { %s1136_s11 = smov 0   ;;  %s1138_s12 = smov 0  }
   0x8   :  { %s1140_s13 = smov 0   ;;  %s1142_s14 = smov 0  }
   0x9   :  { %s1144_s15 = smov 0   ;;  %s1146_s16 = smov 0  }
   0xa LB: > { %1428 = sst [smem:[#allocation11_spill]] %s1095_s14  ;;  %s718_s17 = sadd.s32 4294967295, %s1103_s16   ;;  %s1103_s16 = sphi %s1146_s16, %s19_s16   ;;  %s1099_s15 = sphi %s1144_s15, %s1454_s15   ;;  %s1095_s14 = sphi %s1142_s14, %s1449_s14   ;;  %s1091_s13 = sphi %s1140_s13, %s1453_s13   ;;  %s1087_s12 = sphi %s1138_s12, %s1448_s12   ;;  %s1083_s11 = sphi %s1136_s11, %s1452_s11   ;;  %s1079_s10 = sphi %s1134_s10, %s1451_s10   ;;  %s1075_s9 = sphi %s1132_s9, %s1450_s9  }
   0xb   : > { %s719_s18 = sadd.s32 4294967294, %s1103_s16   ;;  %p68_p0 = scmp.ne.s32.totalorder %s1083_s11, %s1079_s10 }
   0xc   : > { %p69_p1 = scmp.eq.s32.totalorder %s1103_s16, 0  ;;  %p74_p2 = scmp.ne.s32.totalorder %s1079_s10, %s1075_s9 }
   0xd   : > { %p1180_p3 = scmp.eq.s32.totalorder %s718_s17, 0  ;;  %p100_p4 = scmp.eq.s32.totalorder %s718_s17, 3 }
   0xe   : > { %p1184_p5 = por %p69_p1, %p68_p0  ;;  %p106_p6 = scmp.eq.s32.totalorder %s719_s18, 3 }
   0xf   : > { %p1190_p7 = por %p1180_p3, %p74_p2  ;;  %p1194_p8 = por %p100_p4, %p68_p0 }
  0x10   : > { %p1198_p9 = por %p106_p6, %p74_p2  ;;  %p720_p10 = scmp.ge.s32.totalorder %s1103_s16, 1 }
  0x11   : > { %s1431_s22 = scalar_select %p1190_p7, 1, 0 }
  0x12   : > { %s1432_s23 = scalar_select %p1194_p8, 1, 0 }
  0x13   : > { %s1433_s24 = scalar_select %p1198_p9, 1, 0 }
  0x14   : > { %p113_p11 = scmp.lt.s32.totalorder %s1103_s16, 5  ;;  %s1105_s26 = smov [#allocation2]  }
  0x15   : > { %1434 = sst [smem:[#allocation12_spill]] %s1433_s24  ;;  %s125_s27 = sshll.u32 %s1105_s26, 4  ;;  %s126_s27 = int_to_ptr.vmem [resolvable:$true] %s125_s27 }
  0x16   : > { %p1204_p12 = pnand %p720_p10, %p113_p11  ;;  %p872_p0 = scmp.lt.s32.totalorder %s1103_s16, 4 }
  0x17   : > { %s960_s30 = scalar_lea.vmem %s126_s27, 1024  ;;  %p968_p9 = scmp.lt.s32.totalorder %s126_s27, %s126_s27 }
  0x18   : > { %s1435_s25 = scalar_select %p1204_p12, 1, 0 }
  0x19   : > { %p859_p13 = pneg %p1204_p12  ;;  %p1219_p2 = pnand %p872_p0, %p1184_p5 }
  0x1a   : > { %p961_p6 = scmp.ne.s32.totalorder %s126_s27, %s960_s30  ;;  %p969_p8 = scmp.lt.s32.totalorder %s960_s30, %s960_s30 }
  0x1b   : > { %p1213_p1 = pnand %p859_p13, %p1180_p3 }
  0x1c   : > { %p970_p7 = por %p969_p8, %p968_p9 }
  0x1d   : > { %p951_p4 = pneg %p1213_p1 }
  0x1f   : > { %p963_p10 = pnand %p961_p6, %p951_p4 }
  0x21   : > { %p964_p11 = pneg %p963_p10 }
  0x23   : > { %p971_p12 = pnand %p970_p7, %p964_p11 }
  0x25   : > { %974 = shalt.err (!%p971_p12)
}
  0x26   : > { %s1422_s3 = smov 128   ;;  %s1423_s4 = smov 8  }
  0x27   : > { %s1438_s0 = sld [smem:[#allocation14_spill]]  ;;  %s28_s7 = sadd.s32 1, %s1095_s14 }
  0x28   : > { %p29_p5 = scmp.ge.s32.totalorder %s28_s7, 2  ;;  %s31_s8 = sadd.s32 1, %s1099_s15 }
  0x29   : > { %s139_s17 = sand.u32 1, %s1083_s11   ;;  %s847_s18 = smul.u32 24, %s1099_s15 }
  0x2a   : > { %s1456_s7 = smov (%p29_p5, %s28_s7), 0  ;;  %s1458_s8 = smov (!%p29_p5, %s31_s8), %s1099_s15 }
  0x2b   : > { %1439 = sst [smem:[#allocation13_spill]] %s1456_s7  ;;  %s57_s21 = ssub.s32 %s1095_s14, %s1456_s7 }
  0x2c   : > { %p33_p7 = scmp.ge.s32.totalorder %s1458_s8, 2  ;;  %s846_s26 = smul.u32 96, %s139_s17 }
  0x2d   : > { %862 = dma.hbm_to_vmem [thread:$0]  (!%p1213_p1), %s1438_s0, 1024, %s126_s27, [#allocation3], %s1422_s3, %s1422_s3, %s1423_s4  }
  0x2e   : > { %s148_s28 = sadd.s32 %s1095_s14, %s847_s18  ;;  %s1460_s8 = smov (%p33_p7, %s1458_s8), 0 }
  0x2f   : > { %s723_s30 = sshll.u32 %s148_s28, 7  ;;  %s56_s5 = ssub.s32 %s1099_s15, %s1460_s8 }
  0x30   : > { %s150_s19 = scalar_lea.hbm %s1417_s1, %s723_s30  ;;  %s58_s3 = sor.u32 %s57_s21, %s56_s5 }
  0x31   : > { %s143_s4 = scalar_lea.vmem [#allocation5], %s846_s26  ;;  %p59_p8 = scmp.eq.s32.totalorder %s58_s3, 0 }
  0x32   : > { %s151_s0 = sshll.u32 %s143_s4, 4  ;;  %s140_s24 = scalar_lea.sflag [#allocation6], %s139_s17  ;;  %s152_s0 = int_to_ptr.vmem [resolvable:$true] %s151_s0 }
  0x33   : > { %p977_p9 = pneg %p1219_p2  ;;  %s988_s7 = scalar_lea.vmem %s152_s0, 1536 }
  0x34   : > { %p989_p12 = scmp.ne.s32.totalorder %s152_s0, %s988_s7  ;;  %s1108_s18 = smov [#allocation5]  }
  0x35   : > { %s993_s14 = sshll.u32 %s1108_s18, 4  ;;  %s994_s14 = int_to_ptr.vmem [resolvable:$false] %s993_s14 }
  0x36   : > { %p991_p13 = pnand %p989_p12, %p977_p9  ;;  %s995_s28 = scalar_lea.vmem %s994_s14, 3072 }
  0x37   : > { %p996_p1 = scmp.lt.s32.totalorder %s152_s0, %s994_s14  ;;  %p997_p4 = scmp.lt.s32.totalorder %s995_s28, %s988_s7 }
  0x38   : > { %p992_p0 = pneg %p991_p13 }
  0x39   : > { %p998_p6 = por %p997_p4, %p996_p1 }
  0x3b   : > { %p999_p10 = pnand %p998_p6, %p992_p0 }
  0x3d   : > { %1002 = shalt.err (!%p999_p10)
}
  0x3e   : > { %s1109_s21 = smov 256   ;;  %s1440_s4 = smov 8  }
  0x3f   : > { %s1441_s17 = smov 128   ;;  %s1442_s26 = sadd.s32 1, %s1083_s11 }
  0x40   : > { %866 = dma.hbm_to_vmem [thread:$0]  (!%p1219_p2), %s150_s19, 1536, %s152_s0, %s140_s24, %s1109_s21, %s1441_s17, %s1440_s4  }
  0x41   : > { %s1260_s30 = scalar_select %p59_p8, %s1083_s11, %s1442_s26  }
  0x42   : > { %p1443_p11 = scmp.ne.s32.totalorder %s1435_s25, 0 }
  0x44   : > { %163 = sbr.rel (%p1443_p11) target bundleno = 436 (0x1b4), region = 28 }
  0x49   : > { %1062 = dma.done.wait (%p1180_p3), [#allocation3], 1024  }
  0x4a   : > { %1064 = vsyncadd (%p1180_p3), [#allocation3], 4294966272  ;;  %s1269_s14 = sand.u32 1, %s1079_s10   ;;  %p1444_p2 = scmp.ne.s32.totalorder %s1431_s22, 0 }
  0x4b   : > { %s848_s0 = smul.u32 96, %s1269_s14  ;;  %s170_s19 = scalar_lea.sflag [#allocation6], %s1269_s14 }
  0x4d   : > { %s1273_s24 = scalar_lea.vmem [#allocation5], %s848_s0 }
  0x4e   : > { %1066 = dma.done.wait (%p1444_p2), %s170_s19, 1536  }
  0x4f   : > { %1068 = vsyncadd (%p1444_p2), %s170_s19, 4294965760  ;;  %v1110_v0 = vmov 0.0   ;;  %vm1111_vm0 = vmmov 0   ;;  %v209_v1 = vld [vmem:[#allocation2 + $0x38] sm:$0xff]  ;;  %v208_v3 = vld [vmem:[#allocation2 + $0x30] sm:$0xff]  ;;  %vm210_vm1 = vcmask 261120  }
  0x50   : > { %778 = vmatprep.subr.mxu0 %v1110_v0  ;;  %795 = vmatprep.subr.mxu1 %v1110_v0  ;;  %v200_v2 = vld [vmem:[#allocation2 + $0x18] sm:$0xff]  ;;  %v199_v4 = vld [vmem:[#allocation2 + $0x10] sm:$0xff]  ;;  %v207_v5 = vld [vmem:[#allocation2 + $0x28] sm:$0xff]  ;;  %s849_s20 = smul.u32 24, %s1269_s14  ;;  %vm389_vm2 = vcmask 523264   ;;  %s1112_s25 = smov 64  }
  0x51   : > { %786 = vmatprep.mubr.msk.f32.mxu0 %vm1111_vm0, %v1110_v0  ;;  %803 = vmatprep.mubr.msk.f32.mxu1 %vm1111_vm0, %v1110_v0  ;;  %v198_v6 = vld [vmem:[#allocation2 + $0x8] sm:$0xff]  ;;  %v206_v7 = vld [vmem:[#allocation2 + $0x20] sm:$0xff]  ;;  %v726_v9 = vld [vmem:[%s1273_s24 + $0x18] sm:$0xff]  ;;  %s850_s29 = smul.u32 6, %s1091_s13  ;;  %vm599_vm3 = vcmask 1048064   ;;  %s604_s13 = scalar_lea.sflag [#allocation4], %s1269_s14 }
  0x52   : > { %779 = vmatpush3.msra.mxu0 %v209_v1  ;;  %796 = vmatpush3.msra.mxu1 %v200_v2  ;;  %v197_v8 = vld [vmem:[#allocation2] sm:$0xff]  ;;  %v195_v12 = vld [vmem:[%s1273_s24 + $0x8] sm:$0xff]  ;;  %v196_v14 = vld [vmem:[%s1273_s24 + $0x10] sm:$0xff]  ;;  %s1344_s22 = scalar_lea.vmem [#allocation7], %s849_s20  ;;  %p1445_p5 = scmp.ne.s32.totalorder %s1432_s23, 0 }
  0x53   : > { %780 = vmatprep.subr.mxu0 %v1110_v0  ;;  %797 = vmatprep.subr.mxu1 %v1110_v0  ;;  %v194_v10 = vld [vmem:[%s1273_s24] sm:$0xff]  ;;  %v728_v13 = vld [vmem:[%s1273_s24 + $0x28] sm:$0xff]  ;;  %v735_v16 = vld [vmem:[%s1273_s24 + $0x30] sm:$0xff]  ;;  %s615_s3 = sadd.s32 %s1087_s12, %s850_s29  ;;  %s618_s5 = sshll.u32 %s1344_s22, 4  ;;  %s1362_s5 = int_to_ptr.vmem [resolvable:$true] %s618_s5 }
  0x54   : > { %781 = vmatpush3.msra.mxu0 %v208_v3  ;;  %798 = vmatpush3.msra.mxu1 %v199_v4  ;;  %v727_v11 = vld [vmem:[%s1273_s24 + $0x20] sm:$0xff]  ;;  %v738_v15 = vld [vmem:[%s1273_s24 + $0x48] sm:$0xff]  ;;  %v739_v17 = vld [vmem:[%s1273_s24 + $0x50] sm:$0xff]  ;;  %s747_s7 = sshll.u32 %s615_s3, 7  ;;  %s1003_s12 = scalar_lea.vmem %s1362_s5, 384 }
  0x55   : > { %782 = vmatprep.subr.mxu0 %v1110_v0  ;;  %799 = vmatprep.subr.mxu1 %v1110_v0  ;;  %v736_v18 = vld [vmem:[%s1273_s24 + $0x38] sm:$0xff]  ;;  %v737_v20 = vld [vmem:[%s1273_s24 + $0x40] sm:$0xff]  ;;  %s1360_s18 = scalar_lea.hbm %s1418_s2, %s747_s7  ;;  %p1004_p3 = scmp.ne.s32.totalorder %s1362_s5, %s1003_s12 }
  0x56   : > { %783 = vmatpush3.msra.mxu0 %v207_v5  ;;  %800 = vmatpush3.msra.mxu1 %v198_v6  ;;  %v740_v19 = vld [vmem:[%s1273_s24 + $0x58] sm:$0xff]  ;;  %s1113_s28 = smov [#allocation7]  }
  0x57   : > { %784 = vmatprep.subr.mxu0 %v1110_v0  ;;  %801 = vmatprep.subr.mxu1 %v1110_v0  ;;  %p1005_p7 = pnand %p1004_p3, %p1445_p5  ;;  %s1007_s21 = sshll.u32 %s1113_s28, 4  ;;  %s1008_s21 = int_to_ptr.vmem [resolvable:$false] %s1007_s21 }
  0x58   : > { %785 = vmatpush3.msra.mxu0 %v206_v7  ;;  %802 = vmatpush3.msra.mxu1 %v197_v8  ;;  %s1009_s4 = scalar_lea.vmem %s1008_s21, 768  ;;  %p1010_p9 = scmp.lt.s32.totalorder %s1362_s5, %s1008_s21 }
  0x59   : > { %787 = vmatmul.mubr.msk.f32.vlgmr.msra.gmra.mxu0 %vm210_vm1, %v726_v9  ;;  %804 = vmatmul.mubr.msk.f32.vlgmr.msra.gmra.mxu1 %vm210_vm1, %v194_v10  ;;  %p1006_p8 = pneg %p1005_p7  ;;  %p1011_p12 = scmp.lt.s32.totalorder %s1009_s4, %s1003_s12 }
  0x5a   : > { %812 = vmatprep.subr.mxu0 %v1110_v0  ;;  %829 = vmatprep.subr.mxu1 %v1110_v0 }
  0x5b   : > { %813 = vmatpush3.msra.mxu0 %v209_v1  ;;  %830 = vmatpush3.msra.mxu1 %v200_v2  ;;  %p1012_p13 = por %p1011_p12, %p1010_p9 }
  0x5c   : > { %789 = vmatprep.mubr.msk.f32.mxu0 %vm1111_vm0, %v1110_v0  ;;  %806 = vmatprep.mubr.msk.f32.mxu1 %vm1111_vm0, %v1110_v0 }
  0x5d   : > { %814 = vmatprep.subr.mxu0 %v1110_v0  ;;  %831 = vmatprep.subr.mxu1 %v1110_v0  ;;  %p1013_p0 = pnand %p1012_p13, %p1006_p8 }
  0x5e   : > { %790 = vmatmul.mubr.msk.f32.gmra.mxu0 %vm210_vm1, %v727_v11  ;;  %807 = vmatmul.mubr.msk.f32.gmra.mxu1 %vm210_vm1, %v195_v12 }
  0x5f   : > { %815 = vmatpush3.msra.mxu0 %v208_v3  ;;  %832 = vmatpush3.msra.mxu1 %v199_v4 }
  0x60   : > { %816 = vmatprep.subr.mxu0 %v1110_v0  ;;  %833 = vmatprep.subr.mxu1 %v1110_v0 }
  0x61   : > { %792 = vmatprep.mubr.msk.f32.mxu0 %vm1111_vm0, %v1110_v0  ;;  %809 = vmatprep.mubr.msk.f32.mxu1 %vm1111_vm0, %v1110_v0 }
  0x62   : > { %817 = vmatpush3.msra.mxu0 %v207_v5  ;;  %834 = vmatpush3.msra.mxu1 %v198_v6 }
  0x63   : > { %793 = vmatmul.mubr.msk.f32.gmra.mxu0 %vm210_vm1, %v728_v13  ;;  %810 = vmatmul.mubr.msk.f32.gmra.mxu1 %vm210_vm1, %v196_v14 }
  0x64   : > { %818 = vmatprep.subr.mxu0 %v1110_v0  ;;  %835 = vmatprep.subr.mxu1 %v1110_v0 }
  0x65   : > { %819 = vmatpush3.msra.mxu0 %v206_v7  ;;  %836 = vmatpush3.msra.mxu1 %v197_v8 }
  0x66   : > { %820 = vmatprep.mubr.msk.f32.mxu0 %vm1111_vm0, %v1110_v0  ;;  %837 = vmatprep.mubr.msk.f32.mxu1 %vm1111_vm0, %v1110_v0 }
  0x67   : > { %821 = vmatmul.mubr.msk.f32.vlgmr.msra.gmra.mxu0 %vm210_vm1, %v738_v15  ;;  %838 = vmatmul.mubr.msk.f32.vlgmr.msra.gmra.mxu1 %vm210_vm1, %v735_v16 }
  0x68   : > { %823 = vmatprep.mubr.msk.f32.mxu0 %vm1111_vm0, %v1110_v0  ;;  %840 = vmatprep.mubr.msk.f32.mxu1 %vm1111_vm0, %v1110_v0 }
  0x6b   : > { %824 = vmatmul.mubr.msk.f32.gmra.mxu0 %vm210_vm1, %v739_v17  ;;  %841 = vmatmul.mubr.msk.f32.gmra.mxu1 %vm210_vm1, %v736_v18 }
  0x6c   : > { %826 = vmatprep.mubr.msk.f32.mxu0 %vm1111_vm0, %v1110_v0  ;;  %843 = vmatprep.mubr.msk.f32.mxu1 %vm1111_vm0, %v1110_v0 }
  0x6f   : > { %827 = vmatmul.mubr.msk.f32.gmra.mxu0 %vm210_vm1, %v740_v19  ;;  %844 = vmatmul.mubr.msk.f32.gmra.mxu1 %vm210_vm1, %v737_v20 }
 0x119   : > { %v286_v21 = vpop.f32.mrf.mxu0  ;;  %v375_v22 = vpop.f32.mrf.mxu1 }
 0x11a   : > { %v376_v23 = vadd.f32 %v375_v22, %v286_v21 }
 0x11b   : > { %v788_v24 = vpop.f32.mrf.mxu0  ;;  %v805_v25 = vpop.f32.mrf.mxu1 }
 0x11c   : > { %390 = vst.msk [vmem:[%s1344_s22] sm:$0xff] %vm389_vm2, %v376_v23 }
 0x11e   : > { %v291_v26 = vpop.f32.mrf.mxu0  ;;  %v380_v27 = vpop.f32.mrf.mxu1 }
 0x11f   : > { %v381_v28 = vadd.f32 %v380_v27, %v291_v26 }
 0x120   : > { %v791_v29 = vpop.f32.mrf.mxu0  ;;  %v808_v30 = vpop.f32.mrf.mxu1 }
 0x121   : > { %391 = vst.msk [vmem:[%s1344_s22 + $0x8] sm:$0xff] %vm389_vm2, %v381_v28 }
 0x123   : > { %v296_v31 = vpop.f32.mrf.mxu0  ;;  %v385_v32 = vpop.f32.mrf.mxu1 }
 0x124   : > { %v386_v33 = vadd.f32 %v385_v32, %v296_v31 }
 0x125   : > { %v794_v34 = vpop.f32.mrf.mxu0  ;;  %v811_v35 = vpop.f32.mrf.mxu1 }
 0x126   : > { %392 = vst.msk [vmem:[%s1344_s22 + $0x10] sm:$0xff] %vm389_vm2, %v386_v33 }
 0x127   : > { %v484_v36 = vpop.f32.mrf.mxu0  ;;  %v573_v37 = vpop.f32.mrf.mxu1 }
 0x128   : > { %v574_v38 = vadd.f32 %v573_v37, %v484_v36 }
 0x129   : > { %v822_v39 = vpop.f32.mrf.mxu0  ;;  %v839_v40 = vpop.f32.mrf.mxu1 }
 0x12a   : > { %590 = vrot.lane.b32.xlu0 %v574_v38, %s1112_s25 }
 0x12b   : > { %v489_v41 = vpop.f32.mrf.mxu0  ;;  %v578_v42 = vpop.f32.mrf.mxu1 }
 0x12c   : > { %v579_v43 = vadd.f32 %v578_v42, %v489_v41 }
 0x12d   : > { %v825_v44 = vpop.f32.mrf.mxu0  ;;  %v842_v45 = vpop.f32.mrf.mxu1 }
 0x12e   : > { %592 = vrot.lane.b32.xlu0 %v579_v43, %s1112_s25 }
 0x12f   : > { %v494_v46 = vpop.f32.mrf.mxu0  ;;  %v583_v47 = vpop.f32.mrf.mxu1 }
 0x130   : > { %v584_v48 = vadd.f32 %v583_v47, %v494_v46 }
 0x131   : > { %v828_v49 = vpop.f32.mrf.mxu0  ;;  %v845_v50 = vpop.f32.mrf.mxu1 }
 0x132   : > { %594 = vrot.lane.b32.xlu1 %v584_v48, %s1112_s25 }
 0x19c   : > { %v591_v51 = vpop.permute.xlu0 %590 }
 0x19d   : > { %600 = vst.msk [vmem:[%s1344_s22] sm:$0xff] %vm599_vm3, %v591_v51 }
 0x1a0   : > { %v593_v52 = vpop.permute.xlu0 %592 }
 0x1a1   : > { %601 = vst.msk [vmem:[%s1344_s22 + $0x8] sm:$0xff] %vm599_vm3, %v593_v52 }
 0x1a4   : > { %v595_v53 = vpop.permute.xlu1 %594 }
 0x1a5   : > { %602 = vst.msk [vmem:[%s1344_s22 + $0x10] sm:$0xff] %vm599_vm3, %v595_v53 }
 0x1a6   : > { %1016 = shalt.err (!%p1013_p0)
}
 0x1a7   : > { %s1017_s17 = scalar_lea.hbm %s1360_s18, 384  ;;  %s1021_s19 = scalar_lea.hbm %s1418_s2, 1536 }
 0x1a8   : > { %p1018_p1 = scmp.ne.s32.totalorder %s1360_s18, %s1017_s17  ;;  %p1022_p10 = scmp.lt.s32.totalorder %s1360_s18, %s1418_s2 }
 0x1a9   : > { %p1023_p11 = scmp.lt.s32.totalorder %s1021_s19, %s1017_s17 }
 0x1aa   : > { %p1019_p4 = pnand %p1018_p1, %p1445_p5 }
 0x1ab   : > { %p1024_p2 = por %p1023_p11, %p1022_p10 }
 0x1ac   : > { %p1020_p6 = pneg %p1019_p4 }
 0x1ae   : > { %p1025_p3 = pnand %p1024_p2, %p1020_p6 }
 0x1b0   : > { %1028 = shalt.err (!%p1025_p3)
}
 0x1b1   : > { %s1114_s22 = smov 128   ;;  %s1115_s25 = smov 256  }
 0x1b2   : > { %s1116_s29 = smov 8  }
 0x1b3   : > { %857 = dma.vmem_to_hbm [thread:$0]  (%p1445_p5), %s1362_s5, 384, %s1360_s18, %s604_s13, %s1114_s22, %s1115_s25, %s1116_s29  }
 0x1b4 PF: > { %s1446_s3 = sld [smem:[#allocation12_spill]]  ;;  %p874_p7 = scmp.ge.s32.totalorder %s1103_s16, 2 }
 0x1b5   : > { %s633_s7 = sand.u32 1, %s1075_s9  }
 0x1b6   : > { %s634_s27 = scalar_lea.sflag [#allocation4], %s633_s7 }
 0x1ba   : > { %p1447_p8 = scmp.ne.s32.totalorder %s1446_s3, 0 }
 0x1bc   : > { %p868_p9 = pnand %p874_p7, %p1447_p8 }
 0x1be   : > { %p869_p12 = pneg %p868_p9 }
 0x1c0   : > { %1070 = dma.done.wait (%p869_p12), %s634_s27, 384  }
 0x1c1   : > { %1072 = vsyncadd (%p869_p12), %s634_s27, 4294966912  ;;  %s19_s16 = sadd.s32 1, %s1103_s16   ;;  %s1448_s12 = sld [smem:[#allocation11_spill]] }
 0x1c2   : > { %p16_p13 = scmp.ge.s32.totalorder %s19_s16, 6   ;;  %s1449_s14 = sld [smem:[#allocation13_spill]] }
 0x1c3   : > { %s1450_s9 = smov %s1079_s10  ;;  %s1451_s10 = smov %s1083_s11 }
 0x1c4   : > { %s1452_s11 = smov %s1260_s30  ;;  %s1453_s13 = smov %s1099_s15 }
 0x1c5   : > { %s1454_s15 = smov %s1460_s8  ;;  %18 = sbr.rel (!%p16_p13) target bundleno = 10 (0xa), region = 82 }
 0x1ca   :  { %639 = vsyncpa [#allocation3], 1 }
 0x1cb   :  { %641 = vsyncpa [#allocation3 + $0x1], 1 }
 0x1cc   :  { %642 = vsyncpa [#allocation6], 1 }
 0x1cd   :  { %644 = vsyncpa [#allocation6 + $0x1], 1 }
 0x1ce   :  { %645 = vsyncpa [#allocation4], 1 }
 0x1cf   :  { %647 = vsyncpa [#allocation4 + $0x1], 1 }

</bundles_post_ra>
